<compile_context>
chip_gen: v5e
topology: v5e:2x2
jax: 0.10.0
libtpu: 0.0.40
codegen_flags: <defaults>
</compile_context>

<pallas_src>
import functools

import jax
import jax.numpy as jnp
from jax.experimental import pallas as pl
from jax.experimental.pallas import tpu as pltpu


def _round_up(n: int, m: int) -> int:
    return ((n + m - 1) // m) * m


def _deep_linear_kernel(x_ref, w_ref, o_ref, acc_ref):
    """Grid = (batch_tiles, num_layers).

    Folds the running (tb, d_max) slab through one padded weight per grid
    step: acc <- acc @ W_i, with f32 MXU accumulation.
    """
    i = pl.program_id(1)

    @pl.when(i == 0)
    def _():
        acc_ref[...] = x_ref[...].astype(jnp.float32)

    acc_ref[...] = jnp.dot(
        acc_ref[...].astype(w_ref.dtype), w_ref[...],
        preferred_element_type=jnp.float32)

    @pl.when(i == pl.num_programs(1) - 1)
    def _():
        o_ref[...] = acc_ref[...].astype(o_ref.dtype)


@functools.partial(jax.jit, static_argnames=("out_dim", "batch_tile"))
def _deep_linear_forward_impl(x, w_stack, *, out_dim, batch_tile=256):
    """x: (batch, input_dim) f32.  w_stack: (D, d_max, d_max) padded weights."""
    batch, input_dim = x.shape
    num_layers, d_max, _ = w_stack.shape
    compute_dtype = w_stack.dtype
    itemsize = jnp.dtype(compute_dtype).itemsize

    # Batch tiling: one tile for small batch; batch_tile-row tiles (the
    # "parallel" grid axis -> megacore sharding on v7x) once batch is large.
    bp = _round_up(batch, 8)
    if bp <= batch_tile:
        tb = bp
    else:
        tb = batch_tile
        bp = _round_up(batch, batch_tile)

    # Zero-pad x into a lane-dense (bp, d_max) slab (exact for a linear chain).
    x_p = (jnp.zeros((bp, d_max), compute_dtype)
           .at[:batch, :input_dim].set(x.astype(compute_dtype)))

    grid = (bp // tb, num_layers)

    # VMEM budget: double-buffered x / W / out tiles + the f32 accumulator.
    w_tile_b = d_max * d_max * itemsize
    x_tile_b = tb * d_max * itemsize
    o_tile_b = tb * d_max * 4
    acc_b = tb * d_max * 4
    needed = 2 * (w_tile_b + x_tile_b + o_tile_b) + acc_b + (2 << 20)
    vmem_limit = int(min(max(needed, 16 << 20), 64 << 20))

    flops = 2 * bp * d_max * d_max * num_layers
    bytes_accessed = (x_p.size * itemsize + w_stack.size * itemsize
                      + bp * d_max * 4)

    out_p = pl.pallas_call(
        _deep_linear_kernel,
        out_shape=jax.ShapeDtypeStruct((bp, d_max), jnp.float32),
        grid=grid,
        in_specs=[
            pl.BlockSpec((tb, d_max), lambda b, i: (b, 0)),
            pl.BlockSpec((None, d_max, d_max), lambda b, i: (i, 0, 0)),
        ],
        out_specs=pl.BlockSpec((tb, d_max), lambda b, i: (b, 0)),
        scratch_shapes=[pltpu.VMEM((tb, d_max), jnp.float32)],
        compiler_params=pltpu.CompilerParams(
            dimension_semantics=("parallel", "arbitrary"),
            vmem_limit_bytes=vmem_limit),
        cost_estimate=pl.CostEstimate(
            flops=flops, transcendentals=0, bytes_accessed=bytes_accessed),
    )(x_p, w_stack)

    # Slice the valid (batch, out_dim) block back out (still inside jit).
    return out_p[:batch, :out_dim]


def make_deep_linear_forward(weights, *, compute_dtype=jnp.bfloat16,
                             batch_tile=256):
    """Pads + stacks the ParameterList once and returns a jitted forward fn."""
    dims = [weights[0].shape[0]] + [w.shape[1] for w in weights]
    out_dim = int(dims[-1])
    d_max = _round_up(max(dims), 128)

    padded = []
    for w in weights:
        wp = (jnp.zeros((d_max, d_max), compute_dtype)
              .at[:w.shape[0], :w.shape[1]].set(w.astype(compute_dtype)))
        padded.append(wp)
    w_stack = jnp.stack(padded)  # (D, d_max, d_max)

    def forward(x):
        return _deep_linear_forward_impl(
            x, w_stack, out_dim=out_dim, batch_tile=batch_tile)

    return forward


def init_deep_linear_params(key, input_dim, output_dim, hidden_dims,
                            weight_init_type="normal", init_std=0.01):
    """Deterministic re-implementation of DeepLinearNet.__create_layers."""
    dims = [input_dim] + list(hidden_dims) + [output_dim]
    weights = []
    for i in range(len(dims) - 1):
        key, sub = jax.random.split(key)
        in_d, out_d = dims[i], dims[i + 1]
        if weight_init_type == "normal":
            w = jax.random.normal(sub, (in_d, out_d), dtype=jnp.float32) * init_std
        elif weight_init_type == "identity":
            w = init_std * jnp.eye(in_d, out_d, dtype=jnp.float32)
        else:
            raise ValueError(
                f"Unsupported weight initialization type: {weight_init_type}")
        weights.append(w)
    return weights


if __name__ == "__main__":
    # Small shapes consistent with the module: input_dim=32 -> hidden [64, 48]
    # -> output_dim=16, batch=8.
    batch = 8
    input_dim = 32
    hidden_dims = [64, 48]
    output_dim = 16

    key = jax.random.PRNGKey(0)
    key, xkey = jax.random.split(key)
    x = jax.random.normal(xkey, (batch, input_dim), dtype=jnp.float32)

    weights = init_deep_linear_params(
        key, input_dim, output_dim, hidden_dims,
        weight_init_type="normal", init_std=0.01)

    # Pure-JAX f32 reference in the PyTorch order (prod-first).
    prod = weights[0]
    for w in weights[1:]:
        prod = prod @ w
    ref = x @ prod

    # Default perf path: bf16 operands, f32 accumulation -> relative check.
    fwd = make_deep_linear_forward(weights)
    out = jax.block_until_ready(fwd(x))
    assert out.shape == (batch, output_dim)
    rel_err = jnp.linalg.norm(out - ref) / jnp.linalg.norm(ref)
    assert rel_err < 2e-2, f"bf16 path relative error too high: {rel_err}"

    # f32 path: matches the reference tightly (only re-association rounding).
    fwd32 = make_deep_linear_forward(weights, compute_dtype=jnp.float32)
    out32 = jax.block_until_ready(fwd32(x))
    assert jnp.allclose(out32, ref, atol=1e-5, rtol=1e-4), "f32 path mismatch"

    print("KERNEL_OK")
</pallas_src>

<mosaic_0001>
module attributes {stable_mosaic.version = 11 : i64} {
  func.func @_deep_linear_kernel(%arg0: i32, %arg1: i32, %arg2: memref<8x128xbf16, #tpu.memory_space<vmem>>, %arg3: memref<1x128x128xbf16, #tpu.memory_space<vmem>>, %arg4: memref<8x128xf32, #tpu.memory_space<vmem>>, %arg5: memref<8x128xf32, #tpu.memory_space<vmem>>) attributes {dimension_semantics = [#tpu.dimension_semantics<parallel>, #tpu.dimension_semantics<arbitrary>], iteration_bounds = array<i64: 1, 3>, scalar_prefetch = 0 : i64, scratch_operands = 1 : i64, tpu.core_type = #tpu.core_type<tc>, window_params = [{transform_indices = @transform_0, window_bounds = array<i64: 8, 128>}, {transform_indices = @transform_1, window_bounds = array<i64: 1, 128, 128>}, {transform_indices = @transform_2, window_bounds = array<i64: 8, 128>}]} {
    %c0_i32 = arith.constant 0 : i32
    %0 = arith.cmpi eq, %arg1, %c0_i32 : i32
    %1 = arith.extui %0 : i1 to i32
    %c0_i32_0 = arith.constant 0 : i32
    %2 = arith.cmpi ne, %1, %c0_i32_0 : i32
    scf.if %2 {
      %c0_8 = arith.constant 0 : index
      %c0_9 = arith.constant 0 : index
      %12 = vector.load %arg2[%c0_8, %c0_9] : memref<8x128xbf16, #tpu.memory_space<vmem>>, vector<8x128xbf16>
      %13 = arith.extf %12 : vector<8x128xbf16> to vector<8x128xf32>
      %c0_10 = arith.constant 0 : index
      %c0_11 = arith.constant 0 : index
      %14 = vector.load %arg5[%c0_10, %c0_11] : memref<8x128xf32, #tpu.memory_space<vmem>>, vector<8x128xf32>
      tpu.vector_store %arg5[%c0_10, %c0_11], %13 {strides = array<i32>} : memref<8x128xf32, #tpu.memory_space<vmem>>, vector<8x128xf32>,
    } else {
    }
    %c0 = arith.constant 0 : index
    %c0_1 = arith.constant 0 : index
    %3 = vector.load %arg5[%c0, %c0_1] : memref<8x128xf32, #tpu.memory_space<vmem>>, vector<8x128xf32>
    %4 = arith.truncf %3 : vector<8x128xf32> to vector<8x128xbf16>
    %c0_2 = arith.constant 0 : index
    %c0_3 = arith.constant 0 : index
    %c0_4 = arith.constant 0 : index
    %5 = vector.load %arg3[%c0_2, %c0_3, %c0_4] : memref<1x128x128xbf16, #tpu.memory_space<vmem>>, vector<1x128x128xbf16>
    %6 = vector.shape_cast %5 : vector<1x128x128xbf16> to vector<128x128xbf16>
    %cst = arith.constant dense<0.000000e+00> : vector<8x128xf32>
    %7 = tpu.matmul %4, %6, %cst {dimension_numbers = #tpu.dot_dimension_numbers<[1], [0], [0], [1], [0, 0, 1, 1], [], []>} : vector<8x128xbf16>, vector<128x128xbf16>, vector<8x128xf32> -> vector<8x128xf32>
    %c0_5 = arith.constant 0 : index
    %c0_6 = arith.constant 0 : index
    %8 = vector.load %arg5[%c0_5, %c0_6] : memref<8x128xf32, #tpu.memory_space<vmem>>, vector<8x128xf32>
    tpu.vector_store %arg5[%c0_5, %c0_6], %7 {strides = array<i32>} : memref<8x128xf32, #tpu.memory_space<vmem>>, vector<8x128xf32>,
    %c2_i32 = arith.constant 2 : i32
    %9 = arith.cmpi eq, %arg1, %c2_i32 : i32
    %10 = arith.extui %9 : i1 to i32
    %c0_i32_7 = arith.constant 0 : i32
    %11 = arith.cmpi ne, %10, %c0_i32_7 : i32
    scf.if %11 {
      %c0_8 = arith.constant 0 : index
      %c0_9 = arith.constant 0 : index
      %12 = vector.load %arg5[%c0_8, %c0_9] : memref<8x128xf32, #tpu.memory_space<vmem>>, vector<8x128xf32>
      %c0_10 = arith.constant 0 : index
      %c0_11 = arith.constant 0 : index
      %13 = vector.load %arg4[%c0_10, %c0_11] : memref<8x128xf32, #tpu.memory_space<vmem>>, vector<8x128xf32>
      tpu.vector_store %arg4[%c0_10, %c0_11], %12 {strides = array<i32>} : memref<8x128xf32, #tpu.memory_space<vmem>>, vector<8x128xf32>,
    } else {
    }
    return
  }
  func.func @transform_0(%arg0: i32, %arg1: i32) -> (i32, i32) {
    %c0_i32 = arith.constant 0 : i32
    %c0_i32_0 = arith.constant 0 : i32
    return %arg0, %c0_i32 : i32, i32
  }
  func.func @transform_1(%arg0: i32, %arg1: i32) -> (i32, i32, i32) {
    %c0_i32 = arith.constant 0 : i32
    %c0_i32_0 = arith.constant 0 : i32
    %c0_i32_1 = arith.constant 0 : i32
    return %arg1, %c0_i32, %c0_i32_0 : i32, i32, i32
  }
  func.func @transform_2(%arg0: i32, %arg1: i32) -> (i32, i32) {
    %c0_i32 = arith.constant 0 : i32
    %c0_i32_0 = arith.constant 0 : i32
    return %arg0, %c0_i32 : i32, i32
  }
}

</mosaic_0001>

<bundles_post_ra>
// kernel: _deep_linear_forward_impl.1
= control target key start
LH: loop header
LB: loop body
LE: loop exit
PB: predicated region body
PF: predicated region fallthrough
CT: control target
= control target key end

     0   :  { %7 = vsyncpa [#allocation4], 0  ;;  %s713_s0 = inlined_call_operand.vmem [shape: bf16[8,128], index: 0, kind: input, shape index: {}]   ;;  %s714_s1 = inlined_call_operand.hbm [shape: bf16[3,128,128], index: 1, kind: input, shape index: {}]   ;;  %s715_s2 = inlined_call_operand.hbm [shape: f32[8,128], index: 2, kind: output, shape index: {}]  }
   0x1   :  { %9 = vsyncpa [#allocation4 + $0x1], 0 }
   0x2   :  { %10 = vsyncpa [#allocation5], 0  ;;  %s618_s9 = smov 0   ;;  %s620_s10 = smov 0  }
   0x3   :  { %s622_s11 = smov 0   ;;  %s624_s12 = smov 0  }
   0x4   :  { %s626_s13 = smov 0   ;;  %s628_s14 = smov 0  }
   0x5 LB: > { %s366_s15 = sadd.s32 4294967295, %s598_s14   ;;  %s25_s16 = sadd.s32 1, %s594_s13  ;;  %s598_s14 = sphi %s628_s14, %s16_s14   ;;  %s594_s13 = sphi %s626_s13, %s722_s13   ;;  %s590_s12 = sphi %s624_s12, %s721_s12   ;;  %s586_s11 = sphi %s622_s11, %s720_s11   ;;  %s582_s10 = sphi %s620_s10, %s719_s10   ;;  %s578_s9 = sphi %s618_s9, %s718_s9  }
   0x6   : > { %p26_p0 = scmp.ge.s32.totalorder %s25_s16, 3  ;;  %s61_s17 = sadd.s32 1, %s586_s11 }
   0x7   : > { %p68_p1 = scmp.ne.s32.totalorder %s586_s11, %s582_s10  ;;  %p69_p2 = scmp.eq.s32.totalorder %s598_s14, 0 }
   0x8   : > { %s724_s16 = smov (%p26_p0, %s25_s16), 0  ;;  %p74_p4 = scmp.ne.s32.totalorder %s582_s10, %s578_s9 }
   0x9   : > { %p654_p3 = por %p69_p2, %p68_p1  ;;  %s58_s19 = ssub.s32 %s594_s13, %s724_s16 }
   0xa   : > { %p75_p5 = scmp.eq.s32.totalorder %s366_s15, 0  ;;  %p59_p6 = scmp.eq.s32.totalorder %s58_s19, 0 }
   0xb   : > { %p432_p8 = scmp.lt.s32.totalorder %s598_s14, 3  ;;  %s131_s22 = sand.u32 1, %s586_s11  }
   0xc   : > { %p663_p7 = por %p75_p5, %p74_p4  ;;  %s413_s23 = sshll.u32 %s594_s13, 6 }
   0xd   : > { %s669_s21 = scalar_select %p59_p6, %s586_s11, %s61_s17  }
   0xe   : > { %s370_s24 = sshll.u32 %s131_s22, 6  ;;  %s140_s27 = scalar_lea.hbm %s714_s1, %s413_s23 }
   0xf   : > { %s141_s28 = sshll.u32 %s140_s27, 4  ;;  %s135_s29 = scalar_lea.vmem [#allocation3], %s370_s24  ;;  %s142_s28 = int_to_ptr.hbm [resolvable:$true] %s141_s28 }
  0x10   : > { %s143_s30 = sshll.u32 %s135_s29, 4  ;;  %p429_p9 = pnand %p432_p8, %p654_p3  ;;  %s144_s30 = int_to_ptr.vmem [resolvable:$true] %s143_s30 }
  0x11   : > { %p373_p10 = scmp.ge.s32.totalorder %s598_s14, 1  ;;  %p151_p11 = scmp.lt.s32.totalorder %s598_s14, 4 }
  0x12   : > { %s132_s3 = scalar_lea.sflag [#allocation4], %s131_s22  ;;  %s600_s4 = smov 64  }
  0x13   : > { %s601_s5 = smov 4   ;;  %p152_p12 = pnand %p373_p10, %p151_p11 }
  0x14   : > { %431 = dma.hbm_to_vmem [thread:$0]  (!%p429_p9), %s142_s28, 1024, %s144_s30, %s132_s3, %s600_s4, %s600_s4, %s601_s5  }
  0x15   : > { %155 = sbr.rel (%p152_p12) target bundleno = 212 (0xd4), region = 28  ;;  %s157_s6 = sand.u32 (!%p152_p12), 1, %s582_s10  }
  0x16   : > { %s374_s7 = sshll.u32 (!%p152_p12), %s157_s6, 6  ;;  %s158_s8 = scalar_lea.sflag (!%p152_p12), [#allocation4], %s157_s6 }
  0x17   : > { %s161_s9 = scalar_lea.vmem (!%p152_p12), [#allocation3], %s374_s7 }
  0x1a   : > { %569 = dma.done.wait (%p663_p7), %s158_s8, 1024  }
  0x1b   : > { %571 = vsyncadd (%p663_p7), %s158_s8, 4294966272  ;;  %p375_p13 = scmp.ne.s32.totalorder %s590_s12, 0 }
  0x1d   : > { %189 = sbr.rel (%p375_p13) target bundleno = 38 (0x26), region = 36 }
  0x22   : > { %v190_v0 = vld [vmem:[%s713_s0] sm:$0xf] }
  0x23   : > { %v191_v1 = vunpack.c.l.bf16 %v190_v0 }
  0x25   : > { %192 = vst [vmem:[#allocation2] sm:$0xff] %v191_v1 }
  0x26 PF: > { %v421_v2 = vld [vmem:[%s161_s9 + $0x38] sm:$0xff]  ;;  %v420_v3 = vld [vmem:[%s161_s9 + $0x30] sm:$0xff]  ;;  %v419_v4 = vld [vmem:[%s161_s9 + $0x28] sm:$0xff]  ;;  %p408_p0 = scmp.ne.s32.totalorder %s590_s12, 2 }
  0x27   : > { %259 = vmatpush.bf16.msra.mxu0 %v421_v2  ;;  %v418_v5 = vld [vmem:[%s161_s9 + $0x20] sm:$0xff]  ;;  %v417_v6 = vld [vmem:[%s161_s9 + $0x18] sm:$0xff]  ;;  %v416_v7 = vld [vmem:[%s161_s9 + $0x10] sm:$0xff] }
  0x28   : > { %v415_v8 = vld [vmem:[%s161_s9 + $0x8] sm:$0xff]  ;;  %v414_v9 = vld [vmem:[%s161_s9] sm:$0xff] }
  0x2b   : > { %260 = vmatpush.bf16.msra.mxu0 %v420_v3 }
  0x2c   : > { %v193_v10 = vld [vmem:[#allocation2] sm:$0xff] }
  0x2d   : > { %v194_v11 = vpack.c.bf16 %v193_v10, %v193_v10 }
  0x2f   : > { %261 = vmatpush.bf16.msra.mxu0 %v419_v4 }
  0x33   : > { %262 = vmatpush.bf16.msra.mxu0 %v418_v5 }
  0x37   : > { %263 = vmatpush.bf16.msra.mxu0 %v417_v6 }
  0x3b   : > { %264 = vmatpush.bf16.msra.mxu0 %v416_v7 }
  0x3f   : > { %265 = vmatpush.bf16.msra.mxu0 %v415_v8 }
  0x43   : > { %266 = vmatpush.bf16.msra.mxu0 %v414_v9 }
  0x46   : > { %267 = vmatmul.bf16.vlgmr.msra.gmra.mxu0 %v194_v11 }
  0xc3   : > { %v268_v12 = vpop.f32.mrf.mxu0 }
  0xc4   : > { %272 = vst [vmem:[#allocation2] sm:$0xff] %v268_v12 }
  0xc7   : > { %276 = sbr.rel (%p408_p0) target bundleno = 206 (0xce), region = 40 }
  0xcb   : > { %v270_v13 = vpop.f32.mrf.mxu0 }
  0xcc   : > { %v277_v14 = vld [vmem:[#allocation2] sm:$0xff] }
  0xcd   : > { %278 = vst [vmem:[#allocation6] sm:$0xff] %v277_v14 }
  0xce PF: > { %p433_p1 = scmp.eq.s32.totalorder %s366_s15, 2  ;;  %s289_s22 = sshll.u32 %s715_s2, 4  ;;  %s290_s22 = int_to_ptr.hbm [resolvable:$true] %s289_s22 }
  0xcf   : > { %s602_s23 = smov [#allocation6]  }
  0xd0   : > { %s287_s24 = sshll.u32 %s602_s23, 4  ;;  %s288_s24 = int_to_ptr.vmem [resolvable:$true] %s287_s24 }
  0xd1   : > { %425 = dma.vmem_to_hbm [thread:$0]  (%p433_p1), %s288_s24, 128, %s290_s22, [#allocation5]  }
  0xd2   : > { %573 = dma.done.wait (%p433_p1), [#allocation5], 128  }
  0xd3   : > { %575 = vsyncadd (%p433_p1), [#allocation5], 4294967168 }
  0xd4 PF: > { %s16_s14 = sadd.s32 1, %s598_s14   ;;  %s718_s9 = smov %s582_s10 }
  0xd5   : > { %p13_p2 = scmp.ge.s32.totalorder %s16_s14, 5   ;;  %s719_s10 = smov %s586_s11 }
  0xd6   : > { %s720_s11 = smov %s669_s21  ;;  %s721_s12 = smov %s594_s13 }
  0xd7   : > { %s722_s13 = smov %s724_s16  ;;  %15 = sbr.rel (!%p13_p2) target bundleno = 5 (0x5), region = 77 }
  0xdc   :  { %303 = vsyncpa [#allocation4], 1 }
  0xdd   :  { %305 = vsyncpa [#allocation4 + $0x1], 1 }
  0xde   :  { %306 = vsyncpa [#allocation5], 1 }
  0xdf   :  { %308 = vsyncpa [#allocation5 + $0x1], 1 }

</bundles_post_ra>
